<compile_context>
chip_gen: v5e
topology: v5e:2x2
jax: 0.10.0
libtpu: 0.0.40
codegen_flags: <defaults>
</compile_context>

<pallas_src>
import functools

import jax
import jax.numpy as jnp
from jax.experimental import pallas as pl
from jax.experimental.pallas import tpu as pltpu

_BN_EPS = 1e-5  # PyTorch BatchNorm2d default


# ----------------------------- Pallas kernels ------------------------------


def _fused_block_kernel(xc_ref, x_ref, wbr_ref, bbr_ref, w_ref, b_ref,
                        *rest, has_transition):
    """branches(7x7-embedded)+BN+ReLU -> fused [conv1 | transition] 1x1 -> add+ReLU."""
    if has_transition:
        ts_ref, tb_ref, o_ref = rest
    else:
        (o_ref,) = rest

    # 3x3 / 5x5 / 7x7 branch convs as a single matmul (BN scale folded into wbr).
    br = jnp.dot(xc_ref[...], wbr_ref[...], preferred_element_type=jnp.float32)
    br = jnp.maximum(br + bbr_ref[...], 0.0)                 # (tm, 3*Cin) f32

    if has_transition:
        # transition pre-activation: BN -> ReLU on x (Cin lanes).
        t = jnp.maximum(x_ref[...].astype(jnp.float32) * ts_ref[...] + tb_ref[...], 0.0)
        # Single fused matmul: [relu(br) | relu(bn(x))] @ [w1 ; wtr]  (K = 4*Cin = 16).
        operand = jnp.concatenate([br, t], axis=-1).astype(jnp.bfloat16)
        out = jnp.dot(operand, w_ref[...],
                      preferred_element_type=jnp.float32) + b_ref[...]
    else:
        # identity transition: add x straight into the single accumulator.
        out = jnp.dot(br.astype(jnp.bfloat16), w_ref[...],
                      preferred_element_type=jnp.float32) + b_ref[...]
        out = out + x_ref[...].astype(jnp.float32)

    o_ref[...] = jnp.maximum(out, 0.0).astype(o_ref.dtype)   # bf16 lane-dense store


def _oc_conv_kernel(xp_ref, w_ref, b_ref, o_ref, *, TH, W, K):
    """3x3 'same' conv + folded BN + ReLU on a TH-row tile.

    Windows are sliced straight off the padded input ref (pl.ds): no whole-image
    value load and no per-tap slice+reshape repacks.
    """
    row0 = pl.multiple_of(pl.program_id(1) * TH, TH)
    C = xp_ref.shape[-1]
    Cout = o_ref.shape[-1]
    acc = jnp.zeros((TH * W, Cout), jnp.float32)
    for dy in range(K):                                      # unrolled: 9 MXU matmuls
        for dx in range(K):
            win = xp_ref[pl.ds(row0 + dy, TH), pl.ds(dx, W), :]   # (TH, W, C) bf16
            win = win.reshape(TH * W, C)                     # W % 8 == 0 -> layout-free
            acc = acc + jnp.dot(win, w_ref[dy * K + dx],
                                preferred_element_type=jnp.float32)
    y = jnp.maximum(acc + b_ref[...], 0.0)
    o_ref[...] = y.reshape(TH, W, Cout).astype(o_ref.dtype)


# ------------------------------- wrappers -----------------------------------


def _fold_bn(gamma, beta, mean, var, eps=_BN_EPS):
    scale = gamma * jax.lax.rsqrt(var + eps)
    return scale, beta - mean * scale


def _im2col(x, K):
    """(N,H,W,C) -> (N, H*W, K*K*C) 'same'-padded patches (indexing glue, plain JAX).

    Only used for the branch convs where Cin is tiny (49*Cin lanes)."""
    N, H, W, C = x.shape
    p = (K - 1) // 2
    if p:
        x = jnp.pad(x, ((0, 0), (p, p), (p, p), (0, 0)))
    cols = []
    for dy in range(K):
        for dx in range(K):
            cols.append(x[:, dy:dy + H, dx:dx + W, :])
    xc = jnp.concatenate(cols, axis=-1)
    return xc.reshape(N, H * W, K * K * C)


def fused_block_pallas(x_nhwc, params, in_channel, out_channel):
    """out = relu(conv1(cat(conv3,conv5,conv7)(x)) + transition(x)) in one pallas_call."""
    N, H, W, Cin = x_nhwc.shape
    R = N * H * W
    has_transition = (in_channel != out_channel)

    def fold(w, b, bnp):
        s, bb = _fold_bn(**bnp)
        return w * s[None, None, None, :], s * b + bb

    # Zero-embed 3x3 / 5x5 into the 7x7 tap space; fold each branch's BN scale.
    w3, b3 = fold(params["c3_w"], params["c3_b"], params["c3_bn"])
    w5, b5 = fold(params["c5_w"], params["c5_b"], params["c5_bn"])
    w7, b7 = fold(params["c7_w"], params["c7_b"], params["c7_bn"])
    w3 = jnp.pad(w3, ((2, 2), (2, 2), (0, 0), (0, 0)))
    w5 = jnp.pad(w5, ((1, 1), (1, 1), (0, 0), (0, 0)))
    wbr = jnp.concatenate([w3, w5, w7], axis=-1).reshape(49 * Cin, 3 * Cin)
    bbr = jnp.concatenate([b3, b5, b7]).reshape(1, 3 * Cin)

    # conv1 (1x1, 3*Cin -> 256) with its BN folded into weight + bias.
    s1, bb1 = _fold_bn(**params["c1_bn"])
    C1 = params["c1_w"].shape[-1]                            # 256
    w1 = params["c1_w"].reshape(3 * Cin, C1) * s1[None, :]
    b1 = (s1 * params["c1_b"] + bb1).reshape(1, C1)

    # Single im2col at K=7 (tiny: 49*Cin lanes), flattened over (N,H,W).
    xc = _im2col(x_nhwc, 7).reshape(R, 49 * Cin).astype(jnp.bfloat16)
    x_flat = x_nhwc.reshape(R, Cin)

    tm = 128 if R >= 128 else R
    Rp = ((R + tm - 1) // tm) * tm
    if Rp != R:
        xc = jnp.pad(xc, ((0, Rp - R), (0, 0)))
        x_flat = jnp.pad(x_flat, ((0, Rp - R), (0, 0)))

    base_args = [xc, x_flat, wbr.astype(jnp.bfloat16), bbr.astype(jnp.float32)]
    base_specs = [
        pl.BlockSpec((tm, 49 * Cin), lambda i: (i, 0)),
        pl.BlockSpec((tm, Cin), lambda i: (i, 0)),
        pl.BlockSpec((49 * Cin, 3 * Cin), lambda i: (0, 0)),
        pl.BlockSpec((1, 3 * Cin), lambda i: (0, 0)),
    ]

    if has_transition:
        assert out_channel == C1, "conv1 emits 256 ch; residual add needs out_channel==256"
        ts, tb = _fold_bn(**params["tr_bn"])
        wtr = params["tr_w"].reshape(Cin, out_channel)
        btr = params["tr_b"].reshape(1, out_channel)
        # Stack conv1 + transition weights -> one (4*Cin, 256) matmul, single bias.
        w_fused = jnp.concatenate([w1, wtr], axis=0)
        b_fused = b1 + btr
        args = base_args + [w_fused.astype(jnp.bfloat16), b_fused.astype(jnp.float32),
                            ts.reshape(1, Cin).astype(jnp.float32),
                            tb.reshape(1, Cin).astype(jnp.float32)]
        in_specs = base_specs + [
            pl.BlockSpec((4 * Cin, C1), lambda i: (0, 0)),
            pl.BlockSpec((1, C1), lambda i: (0, 0)),
            pl.BlockSpec((1, Cin), lambda i: (0, 0)),
            pl.BlockSpec((1, Cin), lambda i: (0, 0)),
        ]
    else:
        assert Cin == C1, "identity transition requires in_channel == 256"
        args = base_args + [w1.astype(jnp.bfloat16), b1.astype(jnp.float32)]
        in_specs = base_specs + [
            pl.BlockSpec((3 * Cin, C1), lambda i: (0, 0)),
            pl.BlockSpec((1, C1), lambda i: (0, 0)),
        ]

    kernel = functools.partial(_fused_block_kernel, has_transition=has_transition)
    y = pl.pallas_call(
        kernel,
        out_shape=jax.ShapeDtypeStruct((Rp, C1), jnp.bfloat16),   # bf16 intermediate
        grid=(Rp // tm,),
        in_specs=in_specs,
        out_specs=pl.BlockSpec((tm, C1), lambda i: (i, 0)),
        compiler_params=pltpu.CompilerParams(dimension_semantics=("parallel",)),
    )(*args)
    return y[:R].reshape(N, H, W, C1)


def oc_conv3_bn_relu_pallas(x_nhwc, w, b, bnp, th=4):
    """Final 3x3 conv + BN + ReLU; row-tiled, windows sliced from the ref with pl.ds."""
    N, H, W, C = x_nhwc.shape
    K = w.shape[0]
    Cout = w.shape[-1]
    p = (K - 1) // 2
    s, bb = _fold_bn(**bnp)
    wf = (w * s[None, None, None, :]).reshape(K * K, C, Cout).astype(jnp.bfloat16)
    bf = (s * b + bb).reshape(1, Cout).astype(jnp.float32)
    # Kernel A already emits bf16, so this cast is a no-op; pad spatially for 'same'.
    xp = jnp.pad(x_nhwc.astype(jnp.bfloat16), ((0, 0), (p, p), (p, p), (0, 0)))
    Hp, Wp = H + 2 * p, W + 2 * p

    TH = th if (H % th == 0) else H                          # row tile (8 grid steps here)
    kernel = functools.partial(_oc_conv_kernel, TH=TH, W=W, K=K)
    y = pl.pallas_call(
        kernel,
        out_shape=jax.ShapeDtypeStruct((N, H, W, Cout), jnp.float32),
        grid=(N, H // TH),
        in_specs=[
            # Full padded image per batch item stays resident across the H tiles.
            pl.BlockSpec((None, Hp, Wp, C), lambda n, h: (n, 0, 0, 0)),
            pl.BlockSpec((K * K, C, Cout), lambda n, h: (0, 0, 0)),
            pl.BlockSpec((1, Cout), lambda n, h: (0, 0)),
        ],
        out_specs=pl.BlockSpec((None, TH, W, Cout), lambda n, h: (n, h, 0, 0)),
        compiler_params=pltpu.CompilerParams(
            dimension_semantics=("parallel", "parallel")),
    )(xp, wf, bf)
    return y


# --------------------------- parameters / module -----------------------------


def init_params(key, in_channel, out_channel):
    ks = jax.random.split(key, 12)

    def conv(k, K, cin, cout):
        kw, kb = jax.random.split(k)
        w = jax.random.normal(kw, (K, K, cin, cout), jnp.float32) * 0.05
        b = jax.random.normal(kb, (cout,), jnp.float32) * 0.02
        return w, b

    def bn(k, c):
        kg, kb, km, kv = jax.random.split(k, 4)
        return dict(gamma=1.0 + 0.1 * jax.random.normal(kg, (c,), jnp.float32),
                    beta=0.1 * jax.random.normal(kb, (c,), jnp.float32),
                    mean=0.1 * jax.random.normal(km, (c,), jnp.float32),
                    var=1.0 + 0.2 * jax.random.uniform(kv, (c,), jnp.float32))

    p = {}
    p["c3_w"], p["c3_b"] = conv(ks[0], 3, in_channel, in_channel)
    p["c3_bn"] = bn(ks[1], in_channel)
    p["c5_w"], p["c5_b"] = conv(ks[2], 5, in_channel, in_channel)
    p["c5_bn"] = bn(ks[3], in_channel)
    p["c7_w"], p["c7_b"] = conv(ks[4], 7, in_channel, in_channel)
    p["c7_bn"] = bn(ks[5], in_channel)
    p["c1_w"], p["c1_b"] = conv(ks[6], 1, 3 * in_channel, 256)   # conv1 always emits 256 ch
    p["c1_bn"] = bn(ks[7], 256)
    p["oc_w"], p["oc_b"] = conv(ks[8], 3, out_channel, out_channel)
    p["oc_bn"] = bn(ks[9], out_channel)
    if in_channel != out_channel:
        p["tr_bn"] = bn(ks[10], in_channel)
        p["tr_w"], p["tr_b"] = conv(ks[11], 1, in_channel, out_channel)
    return p


def hs_basic_block_pallas(x_nchw, params, in_channel, out_channel):
    # TODO(synk): BatchNorm is reproduced in inference mode (folded running stats);
    # training-mode batch statistics are not computed.
    x = jnp.transpose(x_nchw, (0, 2, 3, 1))                  # NCHW -> NHWC
    out = fused_block_pallas(x, params, in_channel, out_channel)
    out = oc_conv3_bn_relu_pallas(out, params["oc_w"], params["oc_b"], params["oc_bn"])
    return jnp.transpose(out, (0, 3, 1, 2))                  # NHWC -> NCHW


# ------------------------------- reference -----------------------------------


def _conv_ref(x, w, b):
    y = jax.lax.conv_general_dilated(x, w, (1, 1), "SAME",
                                     dimension_numbers=("NHWC", "HWIO", "NHWC"))
    return y + b


def hs_basic_block_ref(x_nchw, params, in_channel, out_channel):
    x = jnp.transpose(x_nchw, (0, 2, 3, 1))

    def cbr(x_, w, b, bnp, relu):
        s, bb = _fold_bn(**bnp)
        y = _conv_ref(x_, w, b) * s + bb
        return jnp.maximum(y, 0.0) if relu else y

    out3 = cbr(x, params["c3_w"], params["c3_b"], params["c3_bn"], True)
    out5 = cbr(x, params["c5_w"], params["c5_b"], params["c5_bn"], True)
    out7 = cbr(x, params["c7_w"], params["c7_b"], params["c7_bn"], True)
    cat = jnp.concatenate([out3, out5, out7], axis=-1)
    out1 = cbr(cat, params["c1_w"], params["c1_b"], params["c1_bn"], False)
    if in_channel != out_channel:
        ts, tb = _fold_bn(**params["tr_bn"])
        out2 = _conv_ref(jnp.maximum(x * ts + tb, 0.0),
                         params["tr_w"], params["tr_b"])
    else:
        out2 = x
    out = jnp.maximum(out1 + out2, 0.0)
    out = cbr(out, params["oc_w"], params["oc_b"], params["oc_bn"], True)
    return jnp.transpose(out, (0, 3, 1, 2))


# --------------------------------- main ---------------------------------------


if __name__ == "__main__":
    # conv1 always emits 256 channels and is added to the transition branch, so the
    # PyTorch forward only type-checks when out_channel == 256.
    in_channel, out_channel = 4, 256
    N, H, W = 2, 16, 16

    key = jax.random.PRNGKey(0)
    kx, kp = jax.random.split(key)
    x = jax.random.normal(kx, (N, in_channel, H, W), jnp.float32)   # NCHW, like PyTorch
    params = init_params(kp, in_channel, out_channel)

    out = hs_basic_block_pallas(x, params, in_channel, out_channel)
    out = jax.block_until_ready(out)

    ref = hs_basic_block_ref(x, params, in_channel, out_channel)
    assert out.shape == (N, out_channel, H, W), out.shape
    max_err = float(jnp.max(jnp.abs(out - ref)))
    # bf16 MXU operands / bf16 intermediate (f32 accumulation): loose-ish tolerance.
    assert jnp.allclose(out, ref, atol=2e-2, rtol=2e-2), max_err
    print("KERNEL_OK")
</pallas_src>

<mosaic_0001>
module attributes {stable_mosaic.version = 11 : i64} {
  func.func @_fused_block_kernel(%arg0: i32, %arg1: memref<128x196xbf16, #tpu.memory_space<vmem>>, %arg2: memref<128x4xf32, #tpu.memory_space<vmem>>, %arg3: memref<196x12xbf16, #tpu.memory_space<vmem>>, %arg4: memref<1x12xf32, #tpu.memory_space<vmem>>, %arg5: memref<16x256xbf16, #tpu.memory_space<vmem>>, %arg6: memref<1x256xf32, #tpu.memory_space<vmem>>, %arg7: memref<1x4xf32, #tpu.memory_space<vmem>>, %arg8: memref<1x4xf32, #tpu.memory_space<vmem>>, %arg9: memref<128x256xbf16, #tpu.memory_space<vmem>>) attributes {dimension_semantics = [#tpu.dimension_semantics<parallel>], iteration_bounds = array<i64: 4>, scalar_prefetch = 0 : i64, scratch_operands = 0 : i64, tpu.core_type = #tpu.core_type<tc>, window_params = [{transform_indices = @transform_0, window_bounds = array<i64: 128, 196>}, {transform_indices = @transform_1, window_bounds = array<i64: 128, 4>}, {pipeline_mode = #tpu.pipeline_mode<synchronous>, transform_indices = @transform_2, window_bounds = array<i64: 196, 12>}, {pipeline_mode = #tpu.pipeline_mode<synchronous>, transform_indices = @transform_3, window_bounds = array<i64: 1, 12>}, {pipeline_mode = #tpu.pipeline_mode<synchronous>, transform_indices = @transform_4, window_bounds = array<i64: 16, 256>}, {pipeline_mode = #tpu.pipeline_mode<synchronous>, transform_indices = @transform_5, window_bounds = array<i64: 1, 256>}, {pipeline_mode = #tpu.pipeline_mode<synchronous>, transform_indices = @transform_6, window_bounds = array<i64: 1, 4>}, {pipeline_mode = #tpu.pipeline_mode<synchronous>, transform_indices = @transform_7, window_bounds = array<i64: 1, 4>}, {transform_indices = @transform_8, window_bounds = array<i64: 128, 256>}]} {
    %c0 = arith.constant 0 : index
    %c0_0 = arith.constant 0 : index
    %0 = vector.load %arg1[%c0, %c0_0] : memref<128x196xbf16, #tpu.memory_space<vmem>>, vector<128x196xbf16>
    %c0_1 = arith.constant 0 : index
    %c0_2 = arith.constant 0 : index
    %1 = vector.load %arg3[%c0_1, %c0_2] : memref<196x12xbf16, #tpu.memory_space<vmem>>, vector<196x12xbf16>
    %cst = arith.constant dense<0.000000e+00> : vector<128x12xf32>
    %2 = tpu.matmul %0, %1, %cst {dimension_numbers = #tpu.dot_dimension_numbers<[1], [0], [0], [1], [0, 0, 1, 1], [], []>} : vector<128x196xbf16>, vector<196x12xbf16>, vector<128x12xf32> -> vector<128x12xf32>
    %c0_3 = arith.constant 0 : index
    %c0_4 = arith.constant 0 : index
    %3 = vector.load %arg4[%c0_3, %c0_4] : memref<1x12xf32, #tpu.memory_space<vmem>>, vector<1x12xf32>
    %4 = vector.broadcast %3 : vector<1x12xf32> to vector<128x12xf32>
    %5 = arith.addf %2, %4 : vector<128x12xf32>
    %cst_5 = arith.constant 0.000000e+00 : f32
    %6 = vector.broadcast %cst_5 : f32 to vector<128x12xf32>
    %7 = arith.maximumf %5, %6 : vector<128x12xf32>
    %c0_6 = arith.constant 0 : index
    %c0_7 = arith.constant 0 : index
    %8 = vector.load %arg2[%c0_6, %c0_7] : memref<128x4xf32, #tpu.memory_space<vmem>>, vector<128x4xf32>
    %c0_8 = arith.constant 0 : index
    %c0_9 = arith.constant 0 : index
    %9 = vector.load %arg7[%c0_8, %c0_9] : memref<1x4xf32, #tpu.memory_space<vmem>>, vector<1x4xf32>
    %10 = vector.broadcast %9 : vector<1x4xf32> to vector<128x4xf32>
    %11 = arith.mulf %8, %10 : vector<128x4xf32>
    %c0_10 = arith.constant 0 : index
    %c0_11 = arith.constant 0 : index
    %12 = vector.load %arg8[%c0_10, %c0_11] : memref<1x4xf32, #tpu.memory_space<vmem>>, vector<1x4xf32>
    %13 = vector.broadcast %12 : vector<1x4xf32> to vector<128x4xf32>
    %14 = arith.addf %11, %13 : vector<128x4xf32>
    %cst_12 = arith.constant 0.000000e+00 : f32
    %15 = vector.broadcast %cst_12 : f32 to vector<128x4xf32>
    %16 = arith.maximumf %14, %15 : vector<128x4xf32>
    %17 = tpu.concatenate %7, %16 in 1 : vector<128x12xf32>, vector<128x4xf32> -> vector<128x16xf32>
    %18 = arith.truncf %17 : vector<128x16xf32> to vector<128x16xbf16>
    %c0_13 = arith.constant 0 : index
    %c0_14 = arith.constant 0 : index
    %19 = vector.load %arg5[%c0_13, %c0_14] : memref<16x256xbf16, #tpu.memory_space<vmem>>, vector<16x256xbf16>
    %cst_15 = arith.constant dense<0.000000e+00> : vector<128x256xf32>
    %20 = tpu.matmul %18, %19, %cst_15 {dimension_numbers = #tpu.dot_dimension_numbers<[1], [0], [0], [1], [0, 0, 1, 1], [], []>} : vector<128x16xbf16>, vector<16x256xbf16>, vector<128x256xf32> -> vector<128x256xf32>
    %c0_16 = arith.constant 0 : index
    %c0_17 = arith.constant 0 : index
    %21 = vector.load %arg6[%c0_16, %c0_17] : memref<1x256xf32, #tpu.memory_space<vmem>>, vector<1x256xf32>
    %22 = vector.broadcast %21 : vector<1x256xf32> to vector<128x256xf32>
    %23 = arith.addf %20, %22 : vector<128x256xf32>
    %cst_18 = arith.constant 0.000000e+00 : f32
    %24 = vector.broadcast %cst_18 : f32 to vector<128x256xf32>
    %25 = arith.maximumf %23, %24 : vector<128x256xf32>
    %26 = arith.truncf %25 : vector<128x256xf32> to vector<128x256xbf16>
    %c0_19 = arith.constant 0 : index
    %c0_20 = arith.constant 0 : index
    %27 = vector.load %arg9[%c0_19, %c0_20] : memref<128x256xbf16, #tpu.memory_space<vmem>>, vector<128x256xbf16>
    tpu.vector_store %arg9[%c0_19, %c0_20], %26 {strides = array<i32>} : memref<128x256xbf16, #tpu.memory_space<vmem>>, vector<128x256xbf16>,
    return
  }
  func.func @transform_0(%arg0: i32) -> (i32, i32) {
    %c0_i32 = arith.constant 0 : i32
    %c0_i32_0 = arith.constant 0 : i32
    return %arg0, %c0_i32 : i32, i32
  }
  func.func @transform_1(%arg0: i32) -> (i32, i32) {
    %c0_i32 = arith.constant 0 : i32
    %c0_i32_0 = arith.constant 0 : i32
    return %arg0, %c0_i32 : i32, i32
  }
  func.func @transform_2(%arg0: i32) -> (i32, i32) {
    %c0_i32 = arith.constant 0 : i32
    %c0_i32_0 = arith.constant 0 : i32
    %c0_i32_1 = arith.constant 0 : i32
    return %c0_i32, %c0_i32_0 : i32, i32
  }
  func.func @transform_3(%arg0: i32) -> (i32, i32) {
    %c0_i32 = arith.constant 0 : i32
    %c0_i32_0 = arith.constant 0 : i32
    %c0_i32_1 = arith.constant 0 : i32
    return %c0_i32, %c0_i32_0 : i32, i32
  }
  func.func @transform_4(%arg0: i32) -> (i32, i32) {
    %c0_i32 = arith.constant 0 : i32
    %c0_i32_0 = arith.constant 0 : i32
    %c0_i32_1 = arith.constant 0 : i32
    return %c0_i32, %c0_i32_0 : i32, i32
  }
  func.func @transform_5(%arg0: i32) -> (i32, i32) {
    %c0_i32 = arith.constant 0 : i32
    %c0_i32_0 = arith.constant 0 : i32
    %c0_i32_1 = arith.constant 0 : i32
    return %c0_i32, %c0_i32_0 : i32, i32
  }
  func.func @transform_6(%arg0: i32) -> (i32, i32) {
    %c0_i32 = arith.constant 0 : i32
    %c0_i32_0 = arith.constant 0 : i32
    %c0_i32_1 = arith.constant 0 : i32
    return %c0_i32, %c0_i32_0 : i32, i32
  }
  func.func @transform_7(%arg0: i32) -> (i32, i32) {
    %c0_i32 = arith.constant 0 : i32
    %c0_i32_0 = arith.constant 0 : i32
    %c0_i32_1 = arith.constant 0 : i32
    return %c0_i32, %c0_i32_0 : i32, i32
  }
  func.func @transform_8(%arg0: i32) -> (i32, i32) {
    %c0_i32 = arith.constant 0 : i32
    %c0_i32_0 = arith.constant 0 : i32
    return %arg0, %c0_i32 : i32, i32
  }
}

</mosaic_0001>

<bundles_post_ra>
// kernel: tpu_custom_call.1
= control target key start
LH: loop header
LB: loop body
LE: loop exit
PB: predicated region body
PF: predicated region fallthrough
CT: control target
= control target key end

     0   :  { %13 = vsyncpa [#allocation3], 0  ;;  %s1878_s0 = inlined_call_operand.vmem [shape: bf16[512,196], index: 0, kind: input, shape index: {}]   ;;  %s1879_s1 = inlined_call_operand.vmem [shape: f32[512,4], index: 1, kind: input, shape index: {}]   ;;  %s1880_s2 = inlined_call_operand.vmem [shape: bf16[196,12], index: 2, kind: input, shape index: {}]   ;;  %s1881_s3 = inlined_call_operand.vmem [shape: f32[1,12], index: 3, kind: input, shape index: {}]   ;;  %s1882_s4 = inlined_call_operand.vmem [shape: bf16[16,256], index: 4, kind: input, shape index: {}]   ;;  %s1883_s5 = inlined_call_operand.vmem [shape: f32[1,256], index: 5, kind: input, shape index: {}]   ;;  %s1884_s6 = inlined_call_operand.vmem [shape: f32[1,4], index: 6, kind: input, shape index: {}]   ;;  %s1885_s7 = inlined_call_operand.vmem [shape: f32[1,4], index: 7, kind: input, shape index: {}]   ;;  %s1886_s8 = inlined_call_operand.hbm [shape: bf16[512,256], index: 8, kind: output, shape index: {}]  }
   0x1   :  { %15 = vsyncpa [#allocation3 + $0x1], 0  ;;  %s1515_s27 = smov 0   ;;  %s1517_s28 = smov 0  }
   0x2   :  { %s1519_s29 = smov 0   ;;  %s1521_s30 = smov 0  }
   0x3 LB: > { %s1536_s9 = sadd.s32 4294967295, %s1465_s30   ;;  %s1125_s10 = sadd.s32 4294967294, %s1465_s30   ;;  %s1465_s30 = sphi %s1521_s30, %s1892_s30   ;;  %s1461_s29 = sphi %s1519_s29, %s1891_s29   ;;  %s1457_s28 = sphi %s1517_s28, %s1890_s28   ;;  %s1453_s27 = sphi %s1515_s27, %s1889_s27  }
   0x4   : > { %s1540_s11 = sadd.s32 1, %s1465_s30   ;;  %s206_s12 = sadd.s32 1, %s1461_s29 }
   0x5   : > { %s203_s13 = ssub.s32 %s1465_s30, %s1540_s11  ;;  %p216_p0 = scmp.ne.s32.totalorder %s1461_s29, %s1457_s28 }
   0x6   : > { %p204_p1 = scmp.eq.s32.totalorder %s203_s13, 0  ;;  %p217_p2 = scmp.eq.s32.totalorder %s1536_s9, 3 }
   0x7   : > { %p222_p3 = scmp.ne.s32.totalorder %s1457_s28, %s1453_s27  ;;  %p223_p4 = scmp.eq.s32.totalorder %s1125_s10, 3 }
   0x8   : > { %s1551_s14 = scalar_select %p204_p1, %s1461_s29, %s206_s12  }
   0x9   : > { %p1553_p5 = por %p217_p2, %p216_p0  ;;  %p1557_p6 = por %p223_p4, %p222_p3 }
   0xa   : > { %p1128_p7 = scmp.ge.s32.totalorder %s1465_s30, 1  ;;  %p278_p8 = scmp.lt.s32.totalorder %s1465_s30, 5 }
   0xc   : > { %p279_p9 = pnand %p1128_p7, %p278_p8 }
   0xd   : > { %s1130_s21 = sshll.u32 (!%p279_p9), %s1536_s9, 4  ;;  %s315_s19 = sand.u32 (!%p279_p9), 1, %s1457_s28  }
   0xe   : > { %282 = sbr.rel (%p279_p9) target bundleno = 456 (0x1c8), region = 52  ;;  %p319_p10 = scmp.lt.s32.totalorder (!%p279_p9), %s1130_s21, 63 }
  0x13   : > { %v1309_v0 = vld [vmem:[%s1880_s2 + $0x38] sm:$0xff]  ;;  %v373_v1 = vld [vmem:[%s1880_s2 + $0x60] sm:$0x3]  ;;  %v1308_v3 = vld [vmem:[%s1880_s2 + $0x30] sm:$0xff]  ;;  %vm550_vm0 = vcmask 1041408   ;;  %s1894_s21 = smov (!%p319_p10, %s1130_s21), 63 }
  0x14   : > { %v499_v2 = vunpack.c.l.b16 %v373_v1  ;;  %554 = vmatpush.bf16.msra.mxu0 %v1309_v0  ;;  %s1285_s24 = sshll.u32 %s1894_s21, 3  ;;  %v1307_v6 = vld [vmem:[%s1880_s2 + $0x28] sm:$0xff]  ;;  %v1313_v7 = vld [vmem:[%s1880_s2 + $0x58] sm:$0xff]  ;;  %v1587_v8 = vld [vmem:[%s1884_s6] ss:$0 sm:$0xff]  ;;  %vm525_vm1 = vcmask 556032  }
  0x15   : > { %s1582_s18 = scalar_lea.vmem %s1879_s1, %s1285_s24  ;;  %v1594_v11 = vld [vmem:[%s1885_s7] ss:$0 sm:$0xff]  ;;  %v1312_v13 = vld [vmem:[%s1880_s2 + $0x50] sm:$0xff]  ;;  %v1305_v18 = vld [vmem:[%s1880_s2 + $0x18] sm:$0xff]  ;;  %s1615_s22 = scalar_lea.vmem %s1878_s0, %s1285_s24  ;;  %vm804_vm2 = vcmask 97280   ;;  %vm847_vm3 = vcmask 130048  }
  0x16   : > { %v512_v4 = vpack.c.b16 %v499_v2, %v499_v2  ;;  %v668_v9 = vld [vmem:[%s1582_s18] sm:$0xff]  ;;  %v669_v10 = vld [vmem:[%s1582_s18 + $0x8] sm:$0xff]  ;;  %v1304_v23 = vld [vmem:[%s1880_s2 + $0x10] sm:$0xff]  ;;  %s1467_s24 = smov 12   ;;  %s1317_s21 = sshll.u32 %s1536_s9, 7 }
  0x17   : > { %v1306_v12 = vld [vmem:[%s1880_s2 + $0x20] sm:$0xff]  ;;  %v688_v14 = vmul.f32 %v1587_v8, %v668_v9  ;;  %v689_v15 = vmul.f32 %v1587_v8, %v669_v10  ;;  %v1311_v19 = vld [vmem:[%s1880_s2 + $0x48] sm:$0xff]  ;;  %v670_v29 = vld [vmem:[%s1582_s18 + $0x10] sm:$0xff]  ;;  %s1047_s26 = scalar_lea.hbm %s1886_s8, %s1317_s21  ;;  %s1035_s9 = scalar_lea.sflag [#allocation3], %s315_s19 }
  0x18   : > { %v552_v5 = vsel %vm550_vm0, %v512_v4, 0  ;;  %555 = vmatpush.bf16.msra.mxu0 %v1308_v3  ;;  %v1310_v24 = vld [vmem:[%s1880_s2 + $0x40] sm:$0xff]  ;;  %v1139_v26 = vld [vmem:[%s1615_s22 + $0x8] sm:$0xf0]  ;;  %v671_v30 = vld [vmem:[%s1582_s18 + $0x18] sm:$0xff]  ;;  %v690_v31 = vmul.f32 %v1587_v8, %v670_v29 }
  0x19   : > { %606 = vmatpush.bf16.msra.mxu1 %v552_v5  ;;  %v708_v16 = vadd.f32 %v1594_v11, %v688_v14  ;;  %v709_v17 = vadd.f32 %v1594_v11, %v689_v15  ;;  %v1286_v25 = vld [vmem:[%s1615_s22 + $0x4] sm:$0xf]  ;;  %v1303_v28 = vld [vmem:[%s1880_s2 + $0x8] sm:$0xff]  ;;  %v691_v32 = vmul.f32 %v1587_v8, %v671_v30  ;;  %v1137_v34 = vld [vmem:[%s1615_s22] sm:$0xf] }
  0x1a   : > { %v1142_v27 = vor.u32 %v1286_v25, %v1139_v26  ;;  %v1302_v33 = vld [vmem:[%s1880_s2] sm:$0xff]  ;;  %v1287_v35 = vld [vmem:[%s1615_s22 + $0x4] sm:$0xf0]  ;;  %v710_v36 = vadd.f32 %v1594_v11, %v690_v31  ;;  %v1288_v42 = vld [vmem:[%s1615_s22 + $0x14] sm:$0xf] }
  0x1b   : > { %v724_v20 = vmax.f32 %v708_v16, 0.0  ;;  %v725_v21 = vmax.f32 %v709_v17, 0.0  ;;  %v711_v37 = vadd.f32 %v1594_v11, %v691_v32  ;;  %v1138_v40 = vor.u32 %v1287_v35, %v1137_v34  ;;  %v1147_v43 = vld [vmem:[%s1615_s22 + $0x18] sm:$0xf0]  ;;  %v672_v45 = vld [vmem:[%s1582_s18 + $0x20] sm:$0xff]  ;;  %v673_v46 = vld [vmem:[%s1582_s18 + $0x28] sm:$0xff] }
  0x1c   : > { %556 = vmatpush.bf16.msra.mxu0 %v1307_v6  ;;  %v726_v38 = vmax.f32 %v710_v36, 0.0  ;;  %v1150_v44 = vor.u32 %v1288_v42, %v1147_v43  ;;  %v692_v47 = vmul.f32 %v1587_v8, %v672_v45  ;;  %v693_v48 = vmul.f32 %v1587_v8, %v673_v46  ;;  %v1145_v49 = vld [vmem:[%s1615_s22 + $0x10] sm:$0xf]  ;;  %v1289_v50 = vld [vmem:[%s1615_s22 + $0x14] sm:$0xf0]  ;;  %v680_v34 = vld [vmem:[%s1582_s18 + $0x60] sm:$0xff] }
  0x1d   : > { %607 = vmatpush.bf16.msra.mxu1 %v1313_v7  ;;  %v1360_v22 = vpack.i.bf16 %v725_v21, %v724_v20  ;;  %v727_v39 = vmax.f32 %v711_v37, 0.0  ;;  %v1146_v55 = vor.u32 %v1289_v50, %v1145_v49  ;;  %v1290_v57 = vld [vmem:[%s1615_s22 + $0x24] sm:$0xf]  ;;  %v1155_v58 = vld [vmem:[%s1615_s22 + $0x28] sm:$0xf0]  ;;  %v674_v60 = vld [vmem:[%s1582_s18 + $0x30] sm:$0xff]  ;;  %v700_v36 = vmul.f32 %v1587_v8, %v680_v34 }
  0x1e   : > { %v712_v51 = vadd.f32 %v1594_v11, %v692_v47  ;;  %v713_v52 = vadd.f32 %v1594_v11, %v693_v48  ;;  %v1158_v59 = vor.u32 %v1290_v57, %v1155_v58  ;;  %v675_v61 = vld [vmem:[%s1582_s18 + $0x38] sm:$0xff]  ;;  %v694_v62 = vmul.f32 %v1587_v8, %v674_v60  ;;  %v1153_v0 = vld [vmem:[%s1615_s22 + $0x20] sm:$0xf]  ;;  %v1291_v1 = vld [vmem:[%s1615_s22 + $0x24] sm:$0xf0] }
  0x1f   : > { %1361 = vrot.lane.b32.xlu0 %v1360_v22, %s1467_s24  ;;  %v1365_v41 = vpack.i.bf16 %v727_v39, %v726_v38  ;;  %v695_v63 = vmul.f32 %v1587_v8, %v675_v61  ;;  %v1154_v6 = vor.u32 %v1291_v1, %v1153_v0  ;;  %v1292_v9 = vld [vmem:[%s1615_s22 + $0x34] sm:$0xf]  ;;  %v1163_v10 = vld [vmem:[%s1615_s22 + $0x38] sm:$0xf0]  ;;  %v1293_v14 = vld [vmem:[%s1615_s22 + $0x34] sm:$0xf0] }
  0x20   : > { %557 = vmatpush.bf16.msra.mxu0 %v1306_v12  ;;  %v728_v53 = vmax.f32 %v712_v51, 0.0  ;;  %v729_v54 = vmax.f32 %v713_v52, 0.0  ;;  %v714_v2 = vadd.f32 %v1594_v11, %v694_v62  ;;  %v1166_v12 = vor.u32 %v1292_v9, %v1163_v10  ;;  %v1294_v16 = vld [vmem:[%s1615_s22 + $0x44] sm:$0xf]  ;;  %v1171_v17 = vld [vmem:[%s1615_s22 + $0x48] sm:$0xf0] }
  0x21   : > { %608 = vmatpush.bf16.msra.mxu1 %v1312_v13  ;;  %v715_v3 = vadd.f32 %v1594_v11, %v695_v63  ;;  %v1161_v13 = vld [vmem:[%s1615_s22 + $0x30] sm:$0xf]  ;;  %v1295_v20 = vld [vmem:[%s1615_s22 + $0x44] sm:$0xf0]  ;;  %v676_v22 = vld [vmem:[%s1582_s18 + $0x40] sm:$0xff] }
  0x22   : > { %v1370_v56 = vpack.i.bf16 %v729_v54, %v728_v53  ;;  %v730_v4 = vmax.f32 %v714_v2, 0.0  ;;  %v1162_v15 = vor.u32 %v1293_v14, %v1161_v13  ;;  %v1296_v26 = vld [vmem:[%s1615_s22 + $0x54] sm:$0xf]  ;;  %v681_v35 = vld [vmem:[%s1582_s18 + $0x68] sm:$0xff]  ;;  %v1177_v38 = vld [vmem:[%s1615_s22 + $0x50] sm:$0xf] }
  0x23   : > { %v731_v5 = vmax.f32 %v715_v3, 0.0  ;;  %v701_v37 = vmul.f32 %v1587_v8, %v681_v35  ;;  %v1297_v39 = vld [vmem:[%s1615_s22 + $0x54] sm:$0xf0]  ;;  %v678_v46 = vld [vmem:[%s1582_s18 + $0x50] sm:$0xff]  ;;  %v1298_v50 = vld [vmem:[%s1615_s22 + $0x64] sm:$0xf] }
  0x24   : > { %558 = vmatpush.bf16.msra.mxu0 %v1305_v18  ;;  %1371 = vrot.lane.b32.xlu1 %v1370_v56, %s1467_s24  ;;  %v1174_v18 = vor.u32 %v1294_v16, %v1171_v17  ;;  %v679_v47 = vld [vmem:[%s1582_s18 + $0x58] sm:$0xff]  ;;  %v698_v48 = vmul.f32 %v1587_v8, %v678_v46  ;;  %v1187_v51 = vld [vmem:[%s1615_s22 + $0x68] sm:$0xf0]  ;;  %v682_v58 = vld [vmem:[%s1582_s18 + $0x70] sm:$0xff] }
  0x25   : > { %609 = vmatpush.bf16.msra.mxu1 %v1311_v19  ;;  %v1375_v7 = vpack.i.bf16 %v731_v5, %v730_v4  ;;  %v1169_v19 = vld [vmem:[%s1615_s22 + $0x40] sm:$0xf]  ;;  %v699_v49 = vmul.f32 %v1587_v8, %v679_v47  ;;  %v1190_v56 = vor.u32 %v1298_v50, %v1187_v51  ;;  %v702_v60 = vmul.f32 %v1587_v8, %v682_v58  ;;  %v1299_v63 = vld [vmem:[%s1615_s22 + $0x64] sm:$0xf0]  ;;  %v1193_v9 = vld [vmem:[%s1615_s22 + $0x70] sm:$0xf] }
  0x26   : > { %v1170_v21 = vor.u32 %v1295_v20, %v1169_v19  ;;  %v718_v52 = vadd.f32 %v1594_v11, %v698_v48  ;;  %v1185_v62 = vld [vmem:[%s1615_s22 + $0x60] sm:$0xf]  ;;  %v1301_v10 = vld [vmem:[%s1615_s22 + $0x74] sm:$0xf0]  ;;  %v1314_v13 = vld [vmem:[%s1882_s4 + $0x4] sm:$0xf] }
  0x27   : > { %1366 = vrot.lane.b32.xlu0 %v1365_v41, %s1467_s24  ;;  %v721_v41 = vadd.f32 %v1594_v11, %v701_v37  ;;  %v719_v53 = vadd.f32 %v1594_v11, %v699_v49  ;;  %v722_v0 = vadd.f32 %v1594_v11, %v702_v60  ;;  %v1186_v4 = vor.u32 %v1299_v63, %v1185_v62  ;;  %v1734_v19 = vld [vmem:[%s1881_s3] ss:$0 sm:$0xff] }
  0x28   : > { %559 = vmatpush.bf16.msra.mxu0 %v1304_v23  ;;  %v677_v23 = vld [vmem:[%s1582_s18 + $0x48] sm:$0xff]  ;;  %v734_v54 = vmax.f32 %v718_v52, 0.0  ;;  %v1194_v17 = vor.u32 %v1301_v10, %v1193_v9 }
  0x29   : > { %610 = vmatpush.bf16.msra.mxu1 %v1310_v24  ;;  %v696_v24 = vmul.f32 %v1587_v8, %v676_v22  ;;  %v697_v25 = vmul.f32 %v1587_v8, %v677_v23  ;;  %v737_v43 = vmax.f32 %v721_v41, 0.0  ;;  %v738_v2 = vmax.f32 %v722_v0, 0.0 }
  0x2b   : > { %v717_v29 = vadd.f32 %v1594_v11, %v697_v25 }
  0x2c   : > { %1247 = vmatmul.msk.bf16.vlgmr.msra.gmra.mxu1 %vm525_vm1, %v1142_v27  ;;  %560 = vmatpush.bf16.msra.mxu0 %v1303_v28  ;;  %v1179_v27 = vld [vmem:[%s1615_s22 + $0x58] sm:$0xf0]  ;;  %v716_v28 = vadd.f32 %v1594_v11, %v696_v24 }
  0x2d   : > { %1376 = vrot.lane.b32.xlu1 %v1375_v7, %s1467_s24  ;;  %v733_v31 = vmax.f32 %v717_v29, 0.0  ;;  %v1182_v32 = vor.u32 %v1296_v26, %v1179_v27  ;;  %v1195_v7 = vld [vmem:[%s1615_s22 + $0x78] sm:$0xf0] }
  0x2e   : > { %v732_v30 = vmax.f32 %v716_v28, 0.0 }
  0x30   : > { %561 = vmatpush.bf16.msra.mxu0 %v1302_v33  ;;  %v1380_v33 = vpack.i.bf16 %v733_v31, %v732_v30 }
  0x32   : > { %1381 = vrot.lane.b32.xlu2 %v1380_v33, %s1467_s24 }
  0x33   : > { %562 = vmatmul.bf16.vlgmr.msra.gmra.mxu0 %v1138_v40  ;;  %v720_v40 = vadd.f32 %v1594_v11, %v700_v36 }
  0x35   : > { %v736_v42 = vmax.f32 %v720_v40, 0.0 }
  0x37   : > { %v1390_v45 = vpack.i.bf16 %v737_v43, %v736_v42 }
  0x39   : > { %1391 = vrot.lane.b32.xlu0 %v1390_v45, %s1467_s24 }
  0x3c   : > { %1248 = vmatmul.msk.bf16.gmra.mxu1 %vm525_vm1, %v1150_v44  ;;  %v1178_v44 = vor.u32 %v1297_v39, %v1177_v38 }
  0x43   : > { %567 = vmatmul.bf16.gmra.mxu0 %v1146_v55  ;;  %v735_v55 = vmax.f32 %v719_v53, 0.0 }
  0x45   : > { %v1385_v57 = vpack.i.bf16 %v735_v55, %v734_v54 }
  0x47   : > { %1386 = vrot.lane.b32.xlu2 %v1385_v57, %s1467_s24 }
  0x4c   : > { %1249 = vmatmul.msk.bf16.gmra.mxu1 %vm525_vm1, %v1158_v59  ;;  %v683_v59 = vld [vmem:[%s1582_s18 + $0x78] sm:$0xff]  ;;  %s1129_s18 = sshll.u32 %s315_s19, 7 }
  0x4d   : > { %v703_v61 = vmul.f32 %v1587_v8, %v683_v59  ;;  %s1796_s20 = scalar_lea.vmem [#allocation2], %s1129_s18  ;;  %s1423_s18 = scalar_lea.hbm %s1886_s8, 512 }
  0x4e   : > { %s1048_s10 = sshll.u32 %s1796_s20, 4  ;;  %s1049_s10 = int_to_ptr.vmem [resolvable:$true] %s1048_s10 }
  0x4f   : > { %v723_v1 = vadd.f32 %v1594_v11, %v703_v61  ;;  %v1315_v11 = vld [vmem:[%s1882_s4 + $0x4] sm:$0xf0] }
  0x51   : > { %v739_v3 = vmax.f32 %v723_v1, 0.0 }
  0x53   : > { %572 = vmatmul.bf16.gmra.mxu0 %v1154_v6  ;;  %v1395_v5 = vpack.i.bf16 %v739_v3, %v738_v2  ;;  %v1300_v6 = vld [vmem:[%s1615_s22 + $0x74] sm:$0xf] }
  0x54   : > { %v1198_v8 = vor.u32 %v1300_v6, %v1195_v7 }
  0x55   : > { %1396 = vrot.lane.b32.xlu1 %v1395_v5, %s1467_s24  ;;  %s1050_s24 = sshll.u32 %s1047_s26, 4  ;;  %s1051_s24 = int_to_ptr.hbm [resolvable:$true] %s1050_s24 }
  0x56   : > { %s1417_s22 = sshra.s32 %s1051_s24, 4  ;;  %s1418_s22 = int_to_ptr.hbm [resolvable:$true] %s1417_s22 }
  0x57   : > { %s1419_s12 = scalar_lea.hbm %s1418_s22, 128  ;;  %p1424_p0 = scmp.lt.s32.totalorder %s1418_s22, %s1886_s8 }
  0x58   : > { %p1420_p11 = scmp.ne.s32.totalorder %s1418_s22, %s1419_s12  ;;  %p1425_p1 = scmp.lt.s32.totalorder %s1423_s18, %s1419_s12 }
  0x5a   : > { %p1421_p12 = pnand %p1420_p11, %p1553_p5  ;;  %p1426_p2 = por %p1425_p1, %p1424_p0 }
  0x5c   : > { %1250 = vmatmul.msk.bf16.gmra.mxu1 %vm525_vm1, %v1166_v12  ;;  %v1257_v12 = vld [vmem:[%s1882_s4] sm:$0xf]  ;;  %p1422_p13 = pneg %p1421_p12 }
  0x5d   : > { %v1258_v14 = vor.u32 %v1315_v11, %v1257_v12 }
  0x5e   : > { %p1427_p3 = pnand %p1426_p2, %p1422_p13 }
  0x5f   : > { %879 = vmatpush.bf16.msra.mxu2 %v1258_v14 }
  0x63   : > { %577 = vmatmul.bf16.gmra.mxu0 %v1162_v15  ;;  %v1259_v15 = vld [vmem:[%s1882_s4 + $0x8] sm:$0xf0] }
  0x64   : > { %v1262_v16 = vor.u32 %v1314_v13, %v1259_v15 }
  0x66   : > { %928 = vmatpush.bf16.msra.mxu3 %v1262_v16 }
  0x6c   : > { %1251 = vmatmul.msk.bf16.gmra.mxu1 %vm525_vm1, %v1174_v18 }
  0x73   : > { %582 = vmatmul.bf16.gmra.mxu0 %v1170_v21 }
  0x7c   : > { %1252 = vmatmul.msk.bf16.gmra.mxu1 %vm525_vm1, %v1182_v32 }
  0x83   : > { %587 = vmatmul.bf16.gmra.mxu0 %v1178_v44 }
  0x8c   : > { %1253 = vmatmul.msk.bf16.gmra.mxu1 %vm525_vm1, %v1190_v56 }
  0x91   : > { %v1362_v24 = vpop.permute.xlu0 %1361 }
  0x92   : > { %v1364_v29 = vunpack.i.h.bf16 %v1362_v24  ;;  %v1363_v30 = vunpack.i.l.bf16 %v1362_v24 }
  0x93   : > { %592 = vmatmul.bf16.gmra.mxu0 %v1186_v4 }
  0x96   : > { %v1372_v56 = vpop.permute.xlu1 %1371 }
  0x97   : > { %v1374_v61 = vunpack.i.h.bf16 %v1372_v56  ;;  %v1373_v62 = vunpack.i.l.bf16 %v1372_v56 }
  0x99   : > { %v1367_v40 = vpop.permute.xlu0 %1366 }
  0x9a   : > { %v1369_v45 = vunpack.i.h.bf16 %v1367_v40  ;;  %v1368_v46 = vunpack.i.l.bf16 %v1367_v40 }
  0x9c   : > { %1254 = vmatmul.msk.bf16.gmra.mxu1 %vm525_vm1, %v1198_v8 }
  0x9f   : > { %v1377_v8 = vpop.permute.xlu1 %1376 }
  0xa0   : > { %v1379_v13 = vunpack.i.h.bf16 %v1377_v8  ;;  %v1378_v14 = vunpack.i.l.bf16 %v1377_v8 }
  0xa3   : > { %597 = vmatmul.bf16.gmra.mxu0 %v1194_v17 }
  0xa9   : > { %v612_v18 = vpop.f32.mrf.mxu1 }
  0xb0   : > { %v563_v20 = vpop.f32.mrf.mxu0 }
  0xb1   : > { %v614_v21 = vpop.f32.mrf.mxu1  ;;  %v564_v22 = vadd.f32 %v1734_v19, %v563_v20 }
  0xb3   : > { %v613_v23 = vadd.f32 %v612_v18, %v564_v22 }
  0xb5   : > { %v652_v28 = vmax.f32 %v613_v23, 0.0 }
  0xb7   : > { %v805_v33 = vsel %vm804_vm2, %v652_v28, %v1363_v30 }
  0xb8   : > { %v565_v25 = vpop.f32.mrf.mxu0 }
  0xb9   : > { %v617_v26 = vpop.f32.mrf.mxu1  ;;  %v566_v27 = vadd.f32 %v1734_v19, %v565_v25  ;;  %v1382_v25 = vpop.permute.xlu2 %1381 }
  0xba   : > { %v1384_v30 = vunpack.i.h.bf16 %v1382_v25 }
  0xbb   : > { %v615_v31 = vadd.f32 %v614_v21, %v566_v27 }
  0xbd   : > { %v653_v32 = vmax.f32 %v615_v31, 0.0  ;;  %v1383_v31 = vunpack.i.l.bf16 %v1382_v25 }
  0xbf   : > { %v806_v34 = vsel %vm804_vm2, %v653_v32, %v1364_v29 }
  0xc0   : > { %v568_v35 = vpop.f32.mrf.mxu0  ;;  %v821_v37 = vpack.c.bf16 %v806_v34, %v805_v33 }
  0xc1   : > { %v619_v36 = vpop.f32.mrf.mxu1  ;;  %v569_v38 = vadd.f32 %v1734_v19, %v568_v35 }
  0xc2   : > { %1263 = vmatmul.msk.bf16.vlgmr.msra.gmra.mxu2 %vm847_vm3, %v821_v37  ;;  %1271 = vmatmul.msk.bf16.vlgmr.msra.gmra.mxu3 %vm847_vm3, %v821_v37 }
  0xc3   : > { %v618_v39 = vadd.f32 %v617_v26, %v569_v38 }
  0xc5   : > { %v654_v44 = vmax.f32 %v618_v39, 0.0 }
  0xc7   : > { %v807_v49 = vsel %vm804_vm2, %v654_v44, %v1368_v46  ;;  %v1397_v8 = vpop.permute.xlu1 %1396 }
  0xc8   : > { %v570_v41 = vpop.f32.mrf.mxu0 }
  0xc9   : > { %v622_v42 = vpop.f32.mrf.mxu1  ;;  %v571_v43 = vadd.f32 %v1734_v19, %v570_v41  ;;  %v1387_v41 = vpop.permute.xlu2 %1386 }
  0xca   : > { %v1388_v46 = vunpack.i.l.bf16 %v1387_v41 }
  0xcb   : > { %v620_v47 = vadd.f32 %v619_v36, %v571_v43 }
  0xcd   : > { %v655_v48 = vmax.f32 %v620_v47, 0.0 }
  0xcf   : > { %v808_v50 = vsel %vm804_vm2, %v655_v48, %v1369_v45  ;;  %v1389_v45 = vunpack.i.h.bf16 %v1387_v41 }
  0xd0   : > { %v573_v51 = vpop.f32.mrf.mxu0  ;;  %v822_v53 = vpack.c.bf16 %v808_v50, %v807_v49 }
  0xd1   : > { %v624_v52 = vpop.f32.mrf.mxu1  ;;  %v574_v54 = vadd.f32 %v1734_v19, %v573_v51 }
  0xd2   : > { %1264 = vmatmul.msk.bf16.gmra.mxu2 %vm847_vm3, %v822_v53  ;;  %1272 = vmatmul.msk.bf16.gmra.mxu3 %vm847_vm3, %v822_v53 }
  0xd3   : > { %v623_v55 = vadd.f32 %v622_v42, %v574_v54 }
  0xd5   : > { %v656_v60 = vmax.f32 %v623_v55, 0.0 }
  0xd7   : > { %v809_v1 = vsel %vm804_vm2, %v656_v60, %v1373_v62 }
  0xd8   : > { %v575_v57 = vpop.f32.mrf.mxu0 }
  0xd9   : > { %v627_v58 = vpop.f32.mrf.mxu1  ;;  %v576_v59 = vadd.f32 %v1734_v19, %v575_v57  ;;  %v1392_v57 = vpop.permute.xlu0 %1391 }
  0xda   : > { %v1393_v62 = vunpack.i.l.bf16 %v1392_v57 }
  0xdb   : > { %v625_v63 = vadd.f32 %v624_v52, %v576_v59 }
  0xdd   : > { %v657_v0 = vmax.f32 %v625_v63, 0.0 }
  0xdf   : > { %v810_v2 = vsel %vm804_vm2, %v657_v0, %v1374_v61  ;;  %v1394_v61 = vunpack.i.h.bf16 %v1392_v57 }
  0xe0   : > { %v578_v3 = vpop.f32.mrf.mxu0  ;;  %v823_v5 = vpack.c.bf16 %v810_v2, %v809_v1 }
  0xe1   : > { %v629_v4 = vpop.f32.mrf.mxu1  ;;  %v579_v6 = vadd.f32 %v1734_v19, %v578_v3 }
  0xe2   : > { %1265 = vmatmul.msk.bf16.gmra.mxu2 %vm847_vm3, %v823_v5  ;;  %1273 = vmatmul.msk.bf16.gmra.mxu3 %vm847_vm3, %v823_v5 }
  0xe3   : > { %v628_v7 = vadd.f32 %v627_v58, %v579_v6 }
  0xe5   : > { %v658_v11 = vmax.f32 %v628_v7, 0.0 }
  0xe7   : > { %v811_v17 = vsel %vm804_vm2, %v658_v11, %v1378_v14  ;;  %v1398_v14 = vunpack.i.l.bf16 %v1397_v8 }
  0xe8   : > { %v580_v9 = vpop.f32.mrf.mxu0 }
  0xe9   : > { %v632_v10 = vpop.f32.mrf.mxu1  ;;  %v581_v12 = vadd.f32 %v1734_v19, %v580_v9 }
  0xeb   : > { %v630_v15 = vadd.f32 %v629_v4, %v581_v12 }
  0xed   : > { %v659_v16 = vmax.f32 %v630_v15, 0.0 }
  0xef   : > { %v812_v18 = vsel %vm804_vm2, %v659_v16, %v1379_v13  ;;  %v1399_v13 = vunpack.i.h.bf16 %v1397_v8 }
  0xf0   : > { %v583_v20 = vpop.f32.mrf.mxu0  ;;  %v824_v22 = vpack.c.bf16 %v812_v18, %v811_v17 }
  0xf1   : > { %v634_v21 = vpop.f32.mrf.mxu1  ;;  %v584_v23 = vadd.f32 %v1734_v19, %v583_v20 }
  0xf2   : > { %1266 = vmatmul.msk.bf16.gmra.mxu2 %vm847_vm3, %v824_v22  ;;  %1274 = vmatmul.msk.bf16.gmra.mxu3 %vm847_vm3, %v824_v22 }
  0xf3   : > { %v633_v24 = vadd.f32 %v632_v10, %v584_v23 }
  0xf5   : > { %v660_v29 = vmax.f32 %v633_v24, 0.0 }
  0xf7   : > { %v813_v34 = vsel %vm804_vm2, %v660_v29, %v1383_v31 }
  0xf8   : > { %v585_v26 = vpop.f32.mrf.mxu0 }
  0xf9   : > { %v637_v27 = vpop.f32.mrf.mxu1  ;;  %v586_v28 = vadd.f32 %v1734_v19, %v585_v26 }
  0xfb   : > { %v635_v32 = vadd.f32 %v634_v21, %v586_v28 }
  0xfd   : > { %v661_v33 = vmax.f32 %v635_v32, 0.0 }
  0xff   : > { %v814_v35 = vsel %vm804_vm2, %v661_v33, %v1384_v30 }
 0x100   : > { %v588_v36 = vpop.f32.mrf.mxu0  ;;  %v825_v37 = vpack.c.bf16 %v814_v35, %v813_v34 }
 0x101   : > { %v639_v38 = vpop.f32.mrf.mxu1  ;;  %v589_v39 = vadd.f32 %v1734_v19, %v588_v36 }
 0x102   : > { %1267 = vmatmul.msk.bf16.gmra.mxu2 %vm847_vm3, %v825_v37  ;;  %1275 = vmatmul.msk.bf16.gmra.mxu3 %vm847_vm3, %v825_v37 }
 0x103   : > { %v638_v40 = vadd.f32 %v637_v27, %v589_v39 }
 0x105   : > { %v662_v44 = vmax.f32 %v638_v40, 0.0 }
 0x107   : > { %v815_v50 = vsel %vm804_vm2, %v662_v44, %v1388_v46 }
 0x108   : > { %v590_v42 = vpop.f32.mrf.mxu0 }
 0x109   : > { %v591_v43 = vadd.f32 %v1734_v19, %v590_v42  ;;  %v642_v48 = vpop.f32.mrf.mxu1 }
 0x10b   : > { %v640_v47 = vadd.f32 %v639_v38, %v591_v43 }
 0x10d   : > { %v663_v49 = vmax.f32 %v640_v47, 0.0 }
 0x10f   : > { %v816_v51 = vsel %vm804_vm2, %v663_v49, %v1389_v45 }
 0x110   : > { %v593_v52 = vpop.f32.mrf.mxu0  ;;  %v826_v53 = vpack.c.bf16 %v816_v51, %v815_v50 }
 0x111   : > { %v594_v54 = vadd.f32 %v1734_v19, %v593_v52  ;;  %v644_v55 = vpop.f32.mrf.mxu1 }
 0x112   : > { %1268 = vmatmul.msk.bf16.gmra.mxu2 %vm847_vm3, %v826_v53  ;;  %1276 = vmatmul.msk.bf16.gmra.mxu3 %vm847_vm3, %v826_v53 }
 0x113   : > { %v643_v56 = vadd.f32 %v642_v48, %v594_v54 }
 0x115   : > { %v664_v60 = vmax.f32 %v643_v56, 0.0 }
 0x117   : > { %v817_v1 = vsel %vm804_vm2, %v664_v60, %v1393_v62 }
 0x118   : > { %v595_v58 = vpop.f32.mrf.mxu0 }
 0x119   : > { %v596_v59 = vadd.f32 %v1734_v19, %v595_v58  ;;  %v647_v3 = vpop.f32.mrf.mxu1 }
 0x11b   : > { %v645_v63 = vadd.f32 %v644_v55, %v596_v59 }
 0x11d   : > { %v665_v0 = vmax.f32 %v645_v63, 0.0 }
 0x11f   : > { %v818_v2 = vsel %vm804_vm2, %v665_v0, %v1394_v61 }
 0x120   : > { %v598_v4 = vpop.f32.mrf.mxu0  ;;  %v827_v5 = vpack.c.bf16 %v818_v2, %v817_v1 }
 0x121   : > { %v599_v6 = vadd.f32 %v1734_v19, %v598_v4  ;;  %v649_v12 = vpop.f32.mrf.mxu1 }
 0x122   : > { %1269 = vmatmul.msk.bf16.gmra.mxu2 %vm847_vm3, %v827_v5  ;;  %1277 = vmatmul.msk.bf16.gmra.mxu3 %vm847_vm3, %v827_v5 }
 0x123   : > { %v648_v7 = vadd.f32 %v647_v3, %v599_v6 }
 0x125   : > { %v666_v11 = vmax.f32 %v648_v7, 0.0 }
 0x127   : > { %v819_v17 = vsel %vm804_vm2, %v666_v11, %v1398_v14 }
 0x128   : > { %v600_v9 = vpop.f32.mrf.mxu0 }
 0x129   : > { %v601_v10 = vadd.f32 %v1734_v19, %v600_v9  ;;  %v831_v19 = vld [vmem:[%s1883_s5] sm:$0x3] }
 0x12a   : > { %v1787_v21 = vperm.slane %v831_v19, 0  ;;  %v1789_v22 = vperm.slane %v831_v19, 1 }
 0x12b   : > { %v650_v15 = vadd.f32 %v649_v12, %v601_v10 }
 0x12d   : > { %v667_v16 = vmax.f32 %v650_v15, 0.0 }
 0x12f   : > { %v820_v18 = vsel %vm804_vm2, %v667_v16, %v1399_v13 }
 0x130   : > { %v828_v20 = vpack.c.bf16 %v820_v18, %v819_v17 }
 0x132   : > { %1270 = vmatmul.msk.bf16.gmra.mxu2 %vm847_vm3, %v828_v20  ;;  %1278 = vmatmul.msk.bf16.gmra.mxu3 %vm847_vm3, %v828_v20 }
 0x145   : > { %v881_v23 = vpop.f32.mrf.mxu2  ;;  %v930_v24 = vpop.f32.mrf.mxu3 }
 0x146   : > { %v882_v25 = vadd.f32 %v881_v23, %v1787_v21  ;;  %v931_v26 = vadd.f32 %v930_v24, %v1789_v22 }
 0x148   : > { %v970_v27 = vmax.f32 %v882_v25, 0.0  ;;  %v971_v28 = vmax.f32 %v931_v26, 0.0 }
 0x14a   : > { %v1002_v29 = vpack.c.bf16 %v971_v28, %v970_v27 }
 0x14c   : > { %1018 = vst [vmem:[%s1796_s20] sm:$0xff] %v1002_v29 }
 0x14d   : > { %v883_v30 = vpop.f32.mrf.mxu2  ;;  %v932_v31 = vpop.f32.mrf.mxu3 }
 0x14e   : > { %v884_v32 = vadd.f32 %v883_v30, %v1787_v21  ;;  %v933_v33 = vadd.f32 %v932_v31, %v1789_v22 }
 0x150   : > { %v972_v34 = vmax.f32 %v884_v32, 0.0  ;;  %v973_v35 = vmax.f32 %v933_v33, 0.0 }
 0x152   : > { %v1003_v36 = vpack.c.bf16 %v973_v35, %v972_v34 }
 0x154   : > { %1019 = vst [vmem:[%s1796_s20 + $0x8] sm:$0xff] %v1003_v36 }
 0x155   : > { %v886_v37 = vpop.f32.mrf.mxu2  ;;  %v935_v38 = vpop.f32.mrf.mxu3 }
 0x156   : > { %v887_v39 = vadd.f32 %v886_v37, %v1787_v21  ;;  %v936_v40 = vadd.f32 %v935_v38, %v1789_v22 }
 0x158   : > { %v974_v41 = vmax.f32 %v887_v39, 0.0  ;;  %v975_v42 = vmax.f32 %v936_v40, 0.0 }
 0x15a   : > { %v1004_v43 = vpack.c.bf16 %v975_v42, %v974_v41 }
 0x15c   : > { %1020 = vst [vmem:[%s1796_s20 + $0x10] sm:$0xff] %v1004_v43 }
 0x15d   : > { %v888_v44 = vpop.f32.mrf.mxu2  ;;  %v937_v45 = vpop.f32.mrf.mxu3 }
 0x15e   : > { %v889_v46 = vadd.f32 %v888_v44, %v1787_v21  ;;  %v938_v47 = vadd.f32 %v937_v45, %v1789_v22 }
 0x160   : > { %v976_v48 = vmax.f32 %v889_v46, 0.0  ;;  %v977_v49 = vmax.f32 %v938_v47, 0.0 }
 0x162   : > { %v1005_v50 = vpack.c.bf16 %v977_v49, %v976_v48 }
 0x164   : > { %1021 = vst [vmem:[%s1796_s20 + $0x18] sm:$0xff] %v1005_v50 }
 0x165   : > { %v891_v51 = vpop.f32.mrf.mxu2  ;;  %v940_v52 = vpop.f32.mrf.mxu3 }
 0x166   : > { %v892_v53 = vadd.f32 %v891_v51, %v1787_v21  ;;  %v941_v54 = vadd.f32 %v940_v52, %v1789_v22 }
 0x168   : > { %v978_v55 = vmax.f32 %v892_v53, 0.0  ;;  %v979_v56 = vmax.f32 %v941_v54, 0.0 }
 0x16a   : > { %v1006_v57 = vpack.c.bf16 %v979_v56, %v978_v55 }
 0x16c   : > { %1022 = vst [vmem:[%s1796_s20 + $0x20] sm:$0xff] %v1006_v57 }
 0x16d   : > { %v893_v58 = vpop.f32.mrf.mxu2  ;;  %v942_v59 = vpop.f32.mrf.mxu3 }
 0x16e   : > { %v894_v60 = vadd.f32 %v893_v58, %v1787_v21  ;;  %v943_v61 = vadd.f32 %v942_v59, %v1789_v22 }
 0x170   : > { %v980_v62 = vmax.f32 %v894_v60, 0.0  ;;  %v981_v63 = vmax.f32 %v943_v61, 0.0 }
 0x172   : > { %v1007_v0 = vpack.c.bf16 %v981_v63, %v980_v62 }
 0x174   : > { %1023 = vst [vmem:[%s1796_s20 + $0x28] sm:$0xff] %v1007_v0 }
 0x175   : > { %v896_v1 = vpop.f32.mrf.mxu2  ;;  %v945_v2 = vpop.f32.mrf.mxu3 }
 0x176   : > { %v897_v3 = vadd.f32 %v896_v1, %v1787_v21  ;;  %v946_v4 = vadd.f32 %v945_v2, %v1789_v22 }
 0x178   : > { %v982_v5 = vmax.f32 %v897_v3, 0.0  ;;  %v983_v6 = vmax.f32 %v946_v4, 0.0 }
 0x17a   : > { %v1008_v7 = vpack.c.bf16 %v983_v6, %v982_v5 }
 0x17c   : > { %1024 = vst [vmem:[%s1796_s20 + $0x30] sm:$0xff] %v1008_v7 }
 0x17d   : > { %v898_v8 = vpop.f32.mrf.mxu2  ;;  %v947_v9 = vpop.f32.mrf.mxu3 }
 0x17e   : > { %v899_v10 = vadd.f32 %v898_v8, %v1787_v21  ;;  %v948_v12 = vadd.f32 %v947_v9, %v1789_v22 }
 0x180   : > { %v984_v11 = vmax.f32 %v899_v10, 0.0  ;;  %v985_v13 = vmax.f32 %v948_v12, 0.0 }
 0x182   : > { %v1009_v14 = vpack.c.bf16 %v985_v13, %v984_v11 }
 0x184   : > { %1025 = vst [vmem:[%s1796_s20 + $0x38] sm:$0xff] %v1009_v14 }
 0x185   : > { %v901_v15 = vpop.f32.mrf.mxu2  ;;  %v950_v16 = vpop.f32.mrf.mxu3 }
 0x186   : > { %v902_v17 = vadd.f32 %v901_v15, %v1787_v21  ;;  %v951_v18 = vadd.f32 %v950_v16, %v1789_v22 }
 0x188   : > { %v986_v20 = vmax.f32 %v902_v17, 0.0  ;;  %v987_v19 = vmax.f32 %v951_v18, 0.0 }
 0x18a   : > { %v1010_v23 = vpack.c.bf16 %v987_v19, %v986_v20 }
 0x18c   : > { %1026 = vst [vmem:[%s1796_s20 + $0x40] sm:$0xff] %v1010_v23 }
 0x18d   : > { %v903_v24 = vpop.f32.mrf.mxu2  ;;  %v952_v25 = vpop.f32.mrf.mxu3 }
 0x18e   : > { %v904_v26 = vadd.f32 %v903_v24, %v1787_v21  ;;  %v953_v27 = vadd.f32 %v952_v25, %v1789_v22 }
 0x190   : > { %v988_v28 = vmax.f32 %v904_v26, 0.0  ;;  %v989_v29 = vmax.f32 %v953_v27, 0.0 }
 0x192   : > { %v1011_v30 = vpack.c.bf16 %v989_v29, %v988_v28 }
 0x194   : > { %1027 = vst [vmem:[%s1796_s20 + $0x48] sm:$0xff] %v1011_v30 }
 0x195   : > { %v906_v31 = vpop.f32.mrf.mxu2  ;;  %v955_v32 = vpop.f32.mrf.mxu3 }
 0x196   : > { %v907_v33 = vadd.f32 %v906_v31, %v1787_v21  ;;  %v956_v34 = vadd.f32 %v955_v32, %v1789_v22 }
 0x198   : > { %v990_v35 = vmax.f32 %v907_v33, 0.0  ;;  %v991_v36 = vmax.f32 %v956_v34, 0.0 }
 0x19a   : > { %v1012_v37 = vpack.c.bf16 %v991_v36, %v990_v35 }
 0x19c   : > { %1028 = vst [vmem:[%s1796_s20 + $0x50] sm:$0xff] %v1012_v37 }
 0x19d   : > { %v908_v38 = vpop.f32.mrf.mxu2  ;;  %v957_v39 = vpop.f32.mrf.mxu3 }
 0x19e   : > { %v909_v40 = vadd.f32 %v908_v38, %v1787_v21  ;;  %v958_v41 = vadd.f32 %v957_v39, %v1789_v22 }
 0x1a0   : > { %v992_v42 = vmax.f32 %v909_v40, 0.0  ;;  %v993_v43 = vmax.f32 %v958_v41, 0.0 }
 0x1a2   : > { %v1013_v44 = vpack.c.bf16 %v993_v43, %v992_v42 }
 0x1a4   : > { %1029 = vst [vmem:[%s1796_s20 + $0x58] sm:$0xff] %v1013_v44 }
 0x1a5   : > { %v911_v45 = vpop.f32.mrf.mxu2  ;;  %v960_v46 = vpop.f32.mrf.mxu3 }
 0x1a6   : > { %v912_v47 = vadd.f32 %v911_v45, %v1787_v21  ;;  %v961_v48 = vadd.f32 %v960_v46, %v1789_v22 }
 0x1a8   : > { %v994_v49 = vmax.f32 %v912_v47, 0.0  ;;  %v995_v50 = vmax.f32 %v961_v48, 0.0 }
 0x1aa   : > { %v1014_v51 = vpack.c.bf16 %v995_v50, %v994_v49 }
 0x1ac   : > { %1030 = vst [vmem:[%s1796_s20 + $0x60] sm:$0xff] %v1014_v51 }
 0x1ad   : > { %v913_v52 = vpop.f32.mrf.mxu2  ;;  %v962_v53 = vpop.f32.mrf.mxu3 }
 0x1ae   : > { %v914_v54 = vadd.f32 %v913_v52, %v1787_v21  ;;  %v963_v55 = vadd.f32 %v962_v53, %v1789_v22 }
 0x1b0   : > { %v996_v56 = vmax.f32 %v914_v54, 0.0  ;;  %v997_v57 = vmax.f32 %v963_v55, 0.0 }
 0x1b2   : > { %v1015_v58 = vpack.c.bf16 %v997_v57, %v996_v56 }
 0x1b4   : > { %1031 = vst [vmem:[%s1796_s20 + $0x68] sm:$0xff] %v1015_v58 }
 0x1b5   : > { %v916_v59 = vpop.f32.mrf.mxu2  ;;  %v965_v60 = vpop.f32.mrf.mxu3 }
 0x1b6   : > { %v917_v61 = vadd.f32 %v916_v59, %v1787_v21  ;;  %v966_v62 = vadd.f32 %v965_v60, %v1789_v22 }
 0x1b8   : > { %v998_v63 = vmax.f32 %v917_v61, 0.0  ;;  %v999_v0 = vmax.f32 %v966_v62, 0.0 }
 0x1ba   : > { %v1016_v1 = vpack.c.bf16 %v999_v0, %v998_v63 }
 0x1bc   : > { %1032 = vst [vmem:[%s1796_s20 + $0x70] sm:$0xff] %v1016_v1 }
 0x1bd   : > { %v918_v2 = vpop.f32.mrf.mxu2  ;;  %v967_v3 = vpop.f32.mrf.mxu3 }
 0x1be   : > { %v919_v4 = vadd.f32 %v918_v2, %v1787_v21  ;;  %v968_v5 = vadd.f32 %v967_v3, %v1789_v22 }
 0x1c0   : > { %v1000_v6 = vmax.f32 %v919_v4, 0.0  ;;  %v1001_v7 = vmax.f32 %v968_v5, 0.0 }
 0x1c2   : > { %v1017_v8 = vpack.c.bf16 %v1001_v7, %v1000_v6 }
 0x1c4   : > { %1033 = vst [vmem:[%s1796_s20 + $0x78] sm:$0xff] %v1017_v8 }
 0x1c5   : > { %1430 = shalt.err (!%p1427_p3)
}
 0x1c6   : > { %s1468_s19 = smov 128   ;;  %s1469_s20 = smov 8  }
 0x1c7   : > { %1318 = dma.vmem_to_hbm [thread:$0]  (%p1553_p5), %s1049_s10, 2048, %s1051_s24, %s1035_s9, %s1468_s19, %s1468_s19, %s1469_s20  }
 0x1c8 PF: > { %p1324_p4 = scmp.ge.s32.totalorder %s1465_s30, 2  ;;  %s1065_s25 = sand.u32 1, %s1453_s27  }
 0x1c9   : > { %s1066_s26 = scalar_lea.sflag [#allocation3], %s1065_s25 }
 0x1ca   : > { %p1321_p7 = pnand %p1324_p4, %p1557_p6 }
 0x1cc   : > { %p1322_p8 = pneg %p1321_p7 }
 0x1ce   : > { %1448 = dma.done.wait (%p1322_p8), %s1066_s26, 2048  }
 0x1cf   : > { %1450 = vsyncadd (%p1322_p8), %s1066_s26, 4294965248  ;;  %p18_p9 = scmp.ge.s32.totalorder %s1540_s11, 6   ;;  %s1889_s27 = smov %s1457_s28 }
 0x1d0   : > { %s1890_s28 = smov %s1461_s29  ;;  %s1891_s29 = smov %s1551_s14 }
 0x1d1   : > { %s1892_s30 = smov %s1540_s11  ;;  %20 = sbr.rel (!%p18_p9) target bundleno = 3 (0x3), region = 90 }
 0x1d6   :  { %1072 = vsyncpa [#allocation3], 1 }
 0x1d7   :  { %1074 = vsyncpa [#allocation3 + $0x1], 1 }

</bundles_post_ra>
